<compile_context>
chip_gen: v5e
topology: v5e:2x2
jax: 0.10.0
libtpu: 0.0.40
codegen_flags: <defaults>
</compile_context>

<pallas_src>
import math
from functools import partial

import jax
import jax.numpy as jnp
from jax.experimental import pallas as pl
from jax.experimental.pallas import tpu as pltpu


def network_kernel(xz_ref, w1_ref, b1_ref, w2_ref, b2_ref,
                   w3_ref, b3_ref, w4_ref, b4_ref, o_ref):
    """Per-channel MLP, channels packed along lanes; datanorm + combine are
    folded into the packed fc1 weights host-side."""
    # fc1 (single merged matmul over [x | z_flat], bf16 operands, f32 acc).
    h = (jnp.dot(xz_ref[...], w1_ref[...], preferred_element_type=jnp.float32)
         + b1_ref[...])
    h = jnp.maximum(h, 0.0)
    # TODO(synk): nn.Dropout(p=0.0) is the identity in forward; omitted.
    h = (jnp.dot(h.astype(jnp.bfloat16), w2_ref[...],
                 preferred_element_type=jnp.float32) + b2_ref[...])
    h = jnp.maximum(h, 0.0)
    h = (jnp.dot(h.astype(jnp.bfloat16), w3_ref[...],
                 preferred_element_type=jnp.float32) + b3_ref[...])
    h = jnp.maximum(h, 0.0)
    # fc4: block-diagonal (L, pnum) matmul -> (TB, pnum) output.
    o_ref[...] = (jnp.dot(h.astype(jnp.bfloat16), w4_ref[...],
                          preferred_element_type=jnp.float32) + b4_ref[...])


def pack_params(params, ydim, pnum, pdim, NH, datanorms=(0.0, 1.0, 0.5, 0.5)):
    """One-time host-side packing: lane-packed / block-diagonal weights with
    the Network datanorm folded into fc1, cast to bf16 for the MXU."""
    x_loc, x_scale, z_loc, z_scale = [jnp.float32(v) for v in datanorms]
    L = pnum * NH

    w1T = jnp.transpose(params["w1"], (0, 2, 1))              # (pnum, D, NH)
    w1y = jnp.transpose(w1T[:, :ydim, :], (1, 0, 2)).reshape(ydim, L)
    w1z = jax.scipy.linalg.block_diag(
        *[w1T[c, ydim:, :] for c in range(pnum)])              # (pnum*pdim, L)
    b1 = params["b1"].reshape(1, L).astype(jnp.float32)

    # Fold (x - x_loc)/x_scale and (z - z_loc)/z_scale into W1 / b1:
    #   yn @ W1y = x @ (W1y/x_scale) - (x_loc/x_scale) * colsum(W1y), etc.
    w1 = jnp.concatenate([w1y / x_scale, w1z / z_scale], axis=0)   # (ydim+Dz, L)
    b1 = (b1
          - (x_loc / x_scale) * jnp.sum(w1y, axis=0, keepdims=True)
          - (z_loc / z_scale) * jnp.sum(w1z, axis=0, keepdims=True))

    w2 = jax.scipy.linalg.block_diag(
        *[params["w2"][c].T for c in range(pnum)])             # (L, L)
    w3 = jax.scipy.linalg.block_diag(
        *[params["w3"][c].T for c in range(pnum)])             # (L, L)
    w4 = jax.scipy.linalg.block_diag(
        *[params["w4"][c].T for c in range(pnum)])             # (L, pnum)

    bf = lambda a: a.astype(jnp.bfloat16)
    f32 = lambda a: a.astype(jnp.float32)
    return dict(
        w1=bf(w1), b1=f32(b1),
        w2=bf(w2), b2=f32(params["b2"].reshape(1, L)),
        w3=bf(w3), b3=f32(params["b3"].reshape(1, L)),
        w4=bf(w4), b4=f32(params["b4"].reshape(1, pnum)),
    )


def _tiled_call(xz, packed, tb):
    """One pallas_call over `rows` batch rows tiled in blocks of `tb` rows.
    Requires rows % tb == 0 and tb % 16 == 0 (bf16 sublane packing) unless
    tb == rows."""
    rows, D = xz.shape
    L = packed["w2"].shape[0]
    pnum = packed["w4"].shape[1]

    resident = lambda shape: pl.BlockSpec(shape, lambda i: (0, 0))
    batched = lambda shape: pl.BlockSpec(shape, lambda i: (i, 0))

    flops = 2 * rows * (D * L + 2 * L * L + L * pnum)
    bytes_accessed = (2 * rows * D                               # bf16 input
                      + 2 * (D * L + 2 * L * L + L * pnum)       # bf16 weights
                      + 4 * (3 * L + pnum)                       # f32 biases
                      + 4 * rows * pnum)                         # f32 output

    return pl.pallas_call(
        network_kernel,
        out_shape=jax.ShapeDtypeStruct((rows, pnum), jnp.float32),
        grid=(rows // tb,),
        in_specs=[
            batched((tb, D)),                                    # [x | z]
            resident((D, L)), resident((1, L)),                  # fc1 (folded)
            resident((L, L)), resident((1, L)),                  # fc2
            resident((L, L)), resident((1, L)),                  # fc3
            resident((L, pnum)), resident((1, pnum)),            # fc4
        ],
        out_specs=batched((tb, pnum)),
        compiler_params=pltpu.CompilerParams(
            dimension_semantics=("parallel",)),                  # v7x: 2-TC shard
        cost_estimate=pl.CostEstimate(
            flops=flops, transcendentals=0, bytes_accessed=bytes_accessed),
    )(xz, packed["w1"], packed["b1"], packed["w2"], packed["b2"],
      packed["w3"], packed["b3"], packed["w4"], packed["b4"])


@partial(jax.jit, static_argnames=("tb",))
def network_forward(x, z, packed, tb=4096):
    """x: (B, ydim), z: (B, pnum, pdim) -> (B, pnum).  head=None.
    `packed` comes from pack_params() (call it ONCE, outside the hot loop).
    tb: batch tile rows; sweep 2048-8192, keep a multiple of 16."""
    B, _ = x.shape
    _, pnum, pdim = z.shape

    xz = jnp.concatenate(
        [x.astype(jnp.float32), z.reshape(B, pnum * pdim).astype(jnp.float32)],
        axis=1).astype(jnp.bfloat16)                             # (B, ydim+Dz)

    # Bulk tiles + small padded tail: no full-array pad of the inputs.
    n_full = B // tb
    parts = []
    if n_full:
        parts.append(_tiled_call(xz[:n_full * tb], packed, tb))
    rem = B - n_full * tb
    if rem:
        rem_p = ((rem + 15) // 16) * 16
        tail = xz[n_full * tb:]
        if rem_p != rem:
            tail = jnp.pad(tail, ((0, rem_p - rem), (0, 0)))
        parts.append(_tiled_call(tail, packed, rem_p)[:rem])
    return parts[0] if len(parts) == 1 else jnp.concatenate(parts, axis=0)


def init_params(key, ydim, pnum, pdim, NH):
    """Deterministic synthetic init, PyTorch LinearWithChannel layout:
    w: (pnum, out, in), b: (pnum, out) with kaiming_uniform(a=sqrt(3))."""
    D = ydim + pdim
    layer_dims = [(D, NH), (NH, NH), (NH, NH), (NH, 1)]
    keys = jax.random.split(key, 2 * len(layer_dims))
    params = {}
    for i, (din, dout) in enumerate(layer_dims, start=1):
        wb = math.sqrt(1.5 / din)       # kaiming_uniform_(a=sqrt(3)) bound
        bb = 1.0 / math.sqrt(din)
        params[f"w{i}"] = jax.random.uniform(
            keys[2 * (i - 1)], (pnum, dout, din), jnp.float32, -wb, wb)
        params[f"b{i}"] = jax.random.uniform(
            keys[2 * (i - 1) + 1], (pnum, dout), jnp.float32, -bb, bb)
    return params


def reference(x, z, params, datanorms=(0.0, 1.0, 0.5, 0.5)):
    """Pure-JAX (f32) mirror of PyTorch Network.forward (head=None)."""
    x_loc, x_scale, z_loc, z_scale = datanorms
    y = (x - x_loc) / x_scale
    zn = (z - z_loc) / z_scale
    B, ydim = y.shape
    _, pnum, pdim = z.shape
    yb = jnp.broadcast_to(y[:, None, :], (B, pnum, ydim))
    h = jnp.concatenate([yb, zn], axis=-1)                       # (B, pnum, D)

    def lin(h, w, b):   # w: (pnum, out, in), b: (pnum, out)
        return jnp.einsum("bpi,poi->bpo", h, w) + b[None]

    h = jax.nn.relu(lin(h, params["w1"], params["b1"]))
    h = jax.nn.relu(lin(h, params["w2"], params["b2"]))
    h = jax.nn.relu(lin(h, params["w3"], params["b3"]))
    return lin(h, params["w4"], params["b4"])[..., 0]            # (B, pnum)


if __name__ == "__main__":
    B, ydim, pnum, pdim, NH = 8, 16, 4, 1, 32                    # pnum*NH = 128 lanes

    key = jax.random.PRNGKey(0)
    k_x, k_z, k_p = jax.random.split(key, 3)
    x = jax.random.normal(k_x, (B, ydim), jnp.float32)
    z = jax.random.uniform(k_z, (B, pnum, pdim), jnp.float32)
    params = init_params(k_p, ydim, pnum, pdim, NH)
    datanorms = (0.0, 1.0, 0.5, 0.5)                             # Network defaults

    packed = pack_params(params, ydim, pnum, pdim, NH, datanorms)  # one-time
    out = network_forward(x, z, packed)
    out = jax.block_until_ready(out)

    ref = reference(x, z, params, datanorms)
    assert out.shape == (B, pnum), out.shape
    # bf16 MXU operands with f32 accumulation -> relaxed tolerance vs f32 ref.
    err = float(jnp.max(jnp.abs(out - ref)))
    assert jnp.allclose(out, ref, atol=5e-2, rtol=5e-2), err
    print("KERNEL_OK")
</pallas_src>

<mosaic_0001>
module attributes {stable_mosaic.version = 11 : i64} {
  func.func @network_kernel(%arg0: i32, %arg1: memref<16x20xbf16, #tpu.memory_space<vmem>>, %arg2: memref<20x128xbf16, #tpu.memory_space<vmem>>, %arg3: memref<1x128xf32, #tpu.memory_space<vmem>>, %arg4: memref<128x128xbf16, #tpu.memory_space<vmem>>, %arg5: memref<1x128xf32, #tpu.memory_space<vmem>>, %arg6: memref<128x128xbf16, #tpu.memory_space<vmem>>, %arg7: memref<1x128xf32, #tpu.memory_space<vmem>>, %arg8: memref<128x4xbf16, #tpu.memory_space<vmem>>, %arg9: memref<1x4xf32, #tpu.memory_space<vmem>>, %arg10: memref<16x4xf32, #tpu.memory_space<vmem>>) attributes {dimension_semantics = [#tpu.dimension_semantics<parallel>], iteration_bounds = array<i64: 1>, scalar_prefetch = 0 : i64, scratch_operands = 0 : i64, tpu.core_type = #tpu.core_type<tc>, window_params = [{transform_indices = @transform_0, window_bounds = array<i64: 16, 20>}, {pipeline_mode = #tpu.pipeline_mode<synchronous>, transform_indices = @transform_1, window_bounds = array<i64: 20, 128>}, {pipeline_mode = #tpu.pipeline_mode<synchronous>, transform_indices = @transform_2, window_bounds = array<i64: 1, 128>}, {pipeline_mode = #tpu.pipeline_mode<synchronous>, transform_indices = @transform_3, window_bounds = array<i64: 128, 128>}, {pipeline_mode = #tpu.pipeline_mode<synchronous>, transform_indices = @transform_4, window_bounds = array<i64: 1, 128>}, {pipeline_mode = #tpu.pipeline_mode<synchronous>, transform_indices = @transform_5, window_bounds = array<i64: 128, 128>}, {pipeline_mode = #tpu.pipeline_mode<synchronous>, transform_indices = @transform_6, window_bounds = array<i64: 1, 128>}, {pipeline_mode = #tpu.pipeline_mode<synchronous>, transform_indices = @transform_7, window_bounds = array<i64: 128, 4>}, {pipeline_mode = #tpu.pipeline_mode<synchronous>, transform_indices = @transform_8, window_bounds = array<i64: 1, 4>}, {transform_indices = @transform_9, window_bounds = array<i64: 16, 4>}]} {
    %c0 = arith.constant 0 : index
    %c0_0 = arith.constant 0 : index
    %0 = vector.load %arg1[%c0, %c0_0] : memref<16x20xbf16, #tpu.memory_space<vmem>>, vector<16x20xbf16>
    %c0_1 = arith.constant 0 : index
    %c0_2 = arith.constant 0 : index
    %1 = vector.load %arg2[%c0_1, %c0_2] : memref<20x128xbf16, #tpu.memory_space<vmem>>, vector<20x128xbf16>
    %cst = arith.constant dense<0.000000e+00> : vector<16x128xf32>
    %2 = tpu.matmul %0, %1, %cst {dimension_numbers = #tpu.dot_dimension_numbers<[1], [0], [0], [1], [0, 0, 1, 1], [], []>} : vector<16x20xbf16>, vector<20x128xbf16>, vector<16x128xf32> -> vector<16x128xf32>
    %c0_3 = arith.constant 0 : index
    %c0_4 = arith.constant 0 : index
    %3 = vector.load %arg3[%c0_3, %c0_4] : memref<1x128xf32, #tpu.memory_space<vmem>>, vector<1x128xf32>
    %4 = vector.broadcast %3 : vector<1x128xf32> to vector<16x128xf32>
    %5 = arith.addf %2, %4 : vector<16x128xf32>
    %cst_5 = arith.constant 0.000000e+00 : f32
    %6 = vector.broadcast %cst_5 : f32 to vector<16x128xf32>
    %7 = arith.maximumf %5, %6 : vector<16x128xf32>
    %8 = arith.truncf %7 : vector<16x128xf32> to vector<16x128xbf16>
    %c0_6 = arith.constant 0 : index
    %c0_7 = arith.constant 0 : index
    %9 = vector.load %arg4[%c0_6, %c0_7] : memref<128x128xbf16, #tpu.memory_space<vmem>>, vector<128x128xbf16>
    %cst_8 = arith.constant dense<0.000000e+00> : vector<16x128xf32>
    %10 = tpu.matmul %8, %9, %cst_8 {dimension_numbers = #tpu.dot_dimension_numbers<[1], [0], [0], [1], [0, 0, 1, 1], [], []>} : vector<16x128xbf16>, vector<128x128xbf16>, vector<16x128xf32> -> vector<16x128xf32>
    %c0_9 = arith.constant 0 : index
    %c0_10 = arith.constant 0 : index
    %11 = vector.load %arg5[%c0_9, %c0_10] : memref<1x128xf32, #tpu.memory_space<vmem>>, vector<1x128xf32>
    %12 = vector.broadcast %11 : vector<1x128xf32> to vector<16x128xf32>
    %13 = arith.addf %10, %12 : vector<16x128xf32>
    %cst_11 = arith.constant 0.000000e+00 : f32
    %14 = vector.broadcast %cst_11 : f32 to vector<16x128xf32>
    %15 = arith.maximumf %13, %14 : vector<16x128xf32>
    %16 = arith.truncf %15 : vector<16x128xf32> to vector<16x128xbf16>
    %c0_12 = arith.constant 0 : index
    %c0_13 = arith.constant 0 : index
    %17 = vector.load %arg6[%c0_12, %c0_13] : memref<128x128xbf16, #tpu.memory_space<vmem>>, vector<128x128xbf16>
    %cst_14 = arith.constant dense<0.000000e+00> : vector<16x128xf32>
    %18 = tpu.matmul %16, %17, %cst_14 {dimension_numbers = #tpu.dot_dimension_numbers<[1], [0], [0], [1], [0, 0, 1, 1], [], []>} : vector<16x128xbf16>, vector<128x128xbf16>, vector<16x128xf32> -> vector<16x128xf32>
    %c0_15 = arith.constant 0 : index
    %c0_16 = arith.constant 0 : index
    %19 = vector.load %arg7[%c0_15, %c0_16] : memref<1x128xf32, #tpu.memory_space<vmem>>, vector<1x128xf32>
    %20 = vector.broadcast %19 : vector<1x128xf32> to vector<16x128xf32>
    %21 = arith.addf %18, %20 : vector<16x128xf32>
    %cst_17 = arith.constant 0.000000e+00 : f32
    %22 = vector.broadcast %cst_17 : f32 to vector<16x128xf32>
    %23 = arith.maximumf %21, %22 : vector<16x128xf32>
    %24 = arith.truncf %23 : vector<16x128xf32> to vector<16x128xbf16>
    %c0_18 = arith.constant 0 : index
    %c0_19 = arith.constant 0 : index
    %25 = vector.load %arg8[%c0_18, %c0_19] : memref<128x4xbf16, #tpu.memory_space<vmem>>, vector<128x4xbf16>
    %cst_20 = arith.constant dense<0.000000e+00> : vector<16x4xf32>
    %26 = tpu.matmul %24, %25, %cst_20 {dimension_numbers = #tpu.dot_dimension_numbers<[1], [0], [0], [1], [0, 0, 1, 1], [], []>} : vector<16x128xbf16>, vector<128x4xbf16>, vector<16x4xf32> -> vector<16x4xf32>
    %c0_21 = arith.constant 0 : index
    %c0_22 = arith.constant 0 : index
    %27 = vector.load %arg9[%c0_21, %c0_22] : memref<1x4xf32, #tpu.memory_space<vmem>>, vector<1x4xf32>
    %28 = vector.broadcast %27 : vector<1x4xf32> to vector<16x4xf32>
    %29 = arith.addf %26, %28 : vector<16x4xf32>
    %c0_23 = arith.constant 0 : index
    %c0_24 = arith.constant 0 : index
    %30 = vector.load %arg10[%c0_23, %c0_24] : memref<16x4xf32, #tpu.memory_space<vmem>>, vector<16x4xf32>
    tpu.vector_store %arg10[%c0_23, %c0_24], %29 {strides = array<i32>} : memref<16x4xf32, #tpu.memory_space<vmem>>, vector<16x4xf32>,
    return
  }
  func.func @transform_0(%arg0: i32) -> (i32, i32) {
    %c0_i32 = arith.constant 0 : i32
    %c0_i32_0 = arith.constant 0 : i32
    return %arg0, %c0_i32 : i32, i32
  }
  func.func @transform_1(%arg0: i32) -> (i32, i32) {
    %c0_i32 = arith.constant 0 : i32
    %c0_i32_0 = arith.constant 0 : i32
    %c0_i32_1 = arith.constant 0 : i32
    return %c0_i32, %c0_i32_0 : i32, i32
  }
  func.func @transform_2(%arg0: i32) -> (i32, i32) {
    %c0_i32 = arith.constant 0 : i32
    %c0_i32_0 = arith.constant 0 : i32
    %c0_i32_1 = arith.constant 0 : i32
    return %c0_i32, %c0_i32_0 : i32, i32
  }
  func.func @transform_3(%arg0: i32) -> (i32, i32) {
    %c0_i32 = arith.constant 0 : i32
    %c0_i32_0 = arith.constant 0 : i32
    %c0_i32_1 = arith.constant 0 : i32
    return %c0_i32, %c0_i32_0 : i32, i32
  }
  func.func @transform_4(%arg0: i32) -> (i32, i32) {
    %c0_i32 = arith.constant 0 : i32
    %c0_i32_0 = arith.constant 0 : i32
    %c0_i32_1 = arith.constant 0 : i32
    return %c0_i32, %c0_i32_0 : i32, i32
  }
  func.func @transform_5(%arg0: i32) -> (i32, i32) {
    %c0_i32 = arith.constant 0 : i32
    %c0_i32_0 = arith.constant 0 : i32
    %c0_i32_1 = arith.constant 0 : i32
    return %c0_i32, %c0_i32_0 : i32, i32
  }
  func.func @transform_6(%arg0: i32) -> (i32, i32) {
    %c0_i32 = arith.constant 0 : i32
    %c0_i32_0 = arith.constant 0 : i32
    %c0_i32_1 = arith.constant 0 : i32
    return %c0_i32, %c0_i32_0 : i32, i32
  }
  func.func @transform_7(%arg0: i32) -> (i32, i32) {
    %c0_i32 = arith.constant 0 : i32
    %c0_i32_0 = arith.constant 0 : i32
    %c0_i32_1 = arith.constant 0 : i32
    return %c0_i32, %c0_i32_0 : i32, i32
  }
  func.func @transform_8(%arg0: i32) -> (i32, i32) {
    %c0_i32 = arith.constant 0 : i32
    %c0_i32_0 = arith.constant 0 : i32
    %c0_i32_1 = arith.constant 0 : i32
    return %c0_i32, %c0_i32_0 : i32, i32
  }
  func.func @transform_9(%arg0: i32) -> (i32, i32) {
    %c0_i32 = arith.constant 0 : i32
    %c0_i32_0 = arith.constant 0 : i32
    return %arg0, %c0_i32 : i32, i32
  }
}

</mosaic_0001>

<bundles_post_ra>
// kernel: network_forward.1
= control target key start
LH: loop header
LB: loop body
LE: loop exit
PB: predicated region body
PF: predicated region fallthrough
CT: control target
= control target key end

     0   :  { %14 = vsyncpa [#allocation3], 0  ;;  %s521_s12 = smov [#allocation2]   ;;  %s522_s14 = smov 64   ;;  %s652_s0 = inlined_call_operand.vmem [shape: bf16[16,20], index: 0, kind: input, shape index: {}]   ;;  %s653_s1 = inlined_call_operand.vmem [shape: bf16[20,128], index: 1, kind: input, shape index: {}]   ;;  %s654_s2 = inlined_call_operand.vmem [shape: f32[1,128], index: 2, kind: input, shape index: {}]   ;;  %s655_s3 = inlined_call_operand.vmem [shape: bf16[128,128], index: 3, kind: input, shape index: {}]   ;;  %s656_s4 = inlined_call_operand.vmem [shape: f32[1,128], index: 4, kind: input, shape index: {}]   ;;  %s657_s5 = inlined_call_operand.hbm [shape: bf16[128,128], index: 5, kind: input, shape index: {}]   ;;  %s658_s6 = inlined_call_operand.vmem [shape: f32[1,128], index: 6, kind: input, shape index: {}]   ;;  %s659_s7 = inlined_call_operand.vmem [shape: bf16[128,4], index: 7, kind: input, shape index: {}]   ;;  %s660_s8 = inlined_call_operand.vmem [shape: f32[1,4], index: 8, kind: input, shape index: {}]   ;;  %s661_s9 = inlined_call_operand.vmem [shape: f32[16,4], index: 9, kind: output, shape index: {}]  }
   0x1   :  { %s29_s11 = sshll.u32 %s657_s5, 4  ;;  %s31_s13 = sshll.u32 %s521_s12, 4  ;;  %s30_s11 = int_to_ptr.hbm [resolvable:$true] %s29_s11  ;;  %s32_s13 = int_to_ptr.vmem [resolvable:$true] %s31_s13 }
   0x2   :  { %s523_s15 = smov 4  }
   0x3   :  { %37 = dma.hbm_to_vmem [thread:$0]  %s30_s11, 1024, %s32_s13, [#allocation3], %s522_s14, %s522_s14, %s523_s15  }
   0x4   :  { %519 = dma.done.wait [#allocation3], 1024  }
   0x5   :  { %520 = vsyncadd [#allocation3], 4294966272  ;;  %v53_v0 = vld [vmem:[%s653_s1 + $0x8] sm:$0x3]  ;;  %v471_v2 = vld [vmem:[%s655_s3 + $0x38] sm:$0xff]  ;;  %vm76_vm0 = vcmask 1041408  }
   0x6   :  { %v68_v1 = vunpack.c.l.b16 %v53_v0  ;;  %v470_v3 = vld [vmem:[%s655_s3 + $0x30] sm:$0xff]  ;;  %165 = vmatpush.bf16.msra.mxu1 %v471_v2  ;;  %v463_v6 = vld [vmem:[%s653_s1] sm:$0xff]  ;;  %v469_v7 = vld [vmem:[%s655_s3 + $0x28] sm:$0xff]  ;;  %vm72_vm1 = vcmask 162816   ;;  %vm349_vm2 = vcmask 31744  }
   0x7   :  { %v462_v8 = vld [vmem:[%s652_s0] sm:$0xff]  ;;  %v467_v10 = vld [vmem:[%s655_s3 + $0x18] sm:$0xff]  ;;  %v466_v11 = vld [vmem:[%s655_s3 + $0x10] sm:$0xff] }
   0x8   :  { %v70_v4 = vpack.c.b16 %v68_v1, %v68_v1  ;;  %v468_v9 = vld [vmem:[%s655_s3 + $0x20] sm:$0xff]  ;;  %v465_v12 = vld [vmem:[%s655_s3 + $0x8] sm:$0xff]  ;;  %v479_v14 = vld [vmem:[#allocation2 + $0x38] sm:$0xff] }
   0x9   :  { %v464_v13 = vld [vmem:[%s655_s3] sm:$0xff]  ;;  %250 = vmatpush.bf16.msra.mxu2 %v479_v14  ;;  %v478_v15 = vld [vmem:[#allocation2 + $0x30] sm:$0xff]  ;;  %v477_v16 = vld [vmem:[#allocation2 + $0x28] sm:$0xff] }
   0xa   :  { %v78_v5 = vsel %vm76_vm0, %v70_v4, 0  ;;  %166 = vmatpush.bf16.msra.mxu1 %v470_v3  ;;  %v476_v17 = vld [vmem:[#allocation2 + $0x20] sm:$0xff]  ;;  %v475_v26 = vld [vmem:[#allocation2 + $0x18] sm:$0xff]  ;;  %v474_v27 = vld [vmem:[#allocation2 + $0x10] sm:$0xff] }
   0xb   :  { %86 = vmatpush.bf16.msra.mxu0 %v78_v5  ;;  %v491_v19 = vld [vmem:[%s654_s2] ss:$0 sm:$0xff]  ;;  %v473_v28 = vld [vmem:[#allocation2 + $0x8] sm:$0xff]  ;;  %v487_v30 = vld [vmem:[%s659_s7 + $0x38] sm:$0xff] }
   0xc   :  { %v472_v29 = vld [vmem:[#allocation2] sm:$0xff]  ;;  %335 = vmatpush.bf16.msra.mxu3 %v487_v30  ;;  %v486_v31 = vld [vmem:[%s659_s7 + $0x30] sm:$0xff]  ;;  %v485_v32 = vld [vmem:[%s659_s7 + $0x28] sm:$0xff] }
   0xd   :  { %251 = vmatpush.bf16.msra.mxu2 %v478_v15  ;;  %v484_v33 = vld [vmem:[%s659_s7 + $0x20] sm:$0xff]  ;;  %v483_v42 = vld [vmem:[%s659_s7 + $0x18] sm:$0xff]  ;;  %v482_v43 = vld [vmem:[%s659_s7 + $0x10] sm:$0xff] }
   0xe   :  { %167 = vmatpush.bf16.msra.mxu1 %v469_v7  ;;  %v492_v35 = vld [vmem:[%s656_s4] ss:$0 sm:$0xff]  ;;  %v481_v44 = vld [vmem:[%s659_s7 + $0x8] sm:$0xff] }
   0xf   :  { %87 = vmatpush.bf16.msra.mxu0 %v463_v6  ;;  %v480_v45 = vld [vmem:[%s659_s7] sm:$0xff] }
  0x10   :  { %336 = vmatpush.bf16.msra.mxu3 %v486_v31  ;;  %v493_v47 = vld [vmem:[%s658_s6] ss:$0 sm:$0xff] }
  0x11   :  { %252 = vmatpush.bf16.msra.mxu2 %v477_v16  ;;  %v494_v54 = vld [vmem:[%s660_s8] ss:$0 sm:$0xff] }
  0x12   :  { %365 = vmatmul.msk.bf16.vlgmr.msra.gmra.mxu0 %vm72_vm1, %v462_v8  ;;  %168 = vmatpush.bf16.msra.mxu1 %v468_v9 }
  0x14   :  { %337 = vmatpush.bf16.msra.mxu3 %v485_v32 }
  0x15   :  { %253 = vmatpush.bf16.msra.mxu2 %v476_v17 }
  0x16   :  { %169 = vmatpush.bf16.msra.mxu1 %v467_v10 }
  0x18   :  { %338 = vmatpush.bf16.msra.mxu3 %v484_v33 }
  0x19   :  { %254 = vmatpush.bf16.msra.mxu2 %v475_v26 }
  0x1a   :  { %170 = vmatpush.bf16.msra.mxu1 %v466_v11 }
  0x1c   :  { %339 = vmatpush.bf16.msra.mxu3 %v483_v42 }
  0x1d   :  { %255 = vmatpush.bf16.msra.mxu2 %v474_v27 }
  0x1e   :  { %171 = vmatpush.bf16.msra.mxu1 %v465_v12 }
  0x20   :  { %340 = vmatpush.bf16.msra.mxu3 %v482_v43 }
  0x21   :  { %256 = vmatpush.bf16.msra.mxu2 %v473_v28 }
  0x22   :  { %172 = vmatpush.bf16.msra.mxu1 %v464_v13 }
  0x24   :  { %341 = vmatpush.bf16.msra.mxu3 %v481_v44 }
  0x25   :  { %257 = vmatpush.bf16.msra.mxu2 %v472_v29 }
  0x28   :  { %342 = vmatpush.bf16.msra.mxu3 %v480_v45 }
  0x8f   :  { %v89_v18 = vpop.f32.mrf.mxu0 }
  0x90   :  { %v90_v20 = vadd.f32 %v491_v19, %v89_v18 }
  0x92   :  { %v94_v23 = vmax.f32 %v90_v20, 0.0 }
  0x97   :  { %v91_v21 = vpop.f32.mrf.mxu0 }
  0x98   :  { %v92_v22 = vadd.f32 %v491_v19, %v91_v21 }
  0x9a   :  { %v95_v24 = vmax.f32 %v92_v22, 0.0 }
  0x9c   :  { %v96_v25 = vpack.c.bf16 %v95_v24, %v94_v23 }
  0x9e   :  { %173 = vmatmul.bf16.vlgmr.msra.gmra.mxu1 %v96_v25 }
 0x11b   :  { %v174_v34 = vpop.f32.mrf.mxu1 }
 0x11c   :  { %v175_v36 = vadd.f32 %v492_v35, %v174_v34 }
 0x11e   :  { %v179_v39 = vmax.f32 %v175_v36, 0.0 }
 0x123   :  { %v176_v37 = vpop.f32.mrf.mxu1 }
 0x124   :  { %v177_v38 = vadd.f32 %v492_v35, %v176_v37 }
 0x126   :  { %v180_v40 = vmax.f32 %v177_v38, 0.0 }
 0x128   :  { %v181_v41 = vpack.c.bf16 %v180_v40, %v179_v39 }
 0x12a   :  { %258 = vmatmul.bf16.vlgmr.msra.gmra.mxu2 %v181_v41 }
 0x1ad   :  { %v259_v46 = vpop.f32.mrf.mxu2 }
 0x1ae   :  { %v260_v48 = vadd.f32 %v493_v47, %v259_v46 }
 0x1b0   :  { %v264_v51 = vmax.f32 %v260_v48, 0.0 }
 0x1b5   :  { %v261_v49 = vpop.f32.mrf.mxu2 }
 0x1b6   :  { %v262_v50 = vadd.f32 %v493_v47, %v261_v49 }
 0x1b8   :  { %v265_v52 = vmax.f32 %v262_v50, 0.0 }
 0x1ba   :  { %v266_v53 = vpack.c.bf16 %v265_v52, %v264_v51 }
 0x1bc   :  { %343 = vmatmul.bf16.vlgmr.msra.gmra.mxu3 %v266_v53 }
 0x23f   :  { %v344_v55 = vpop.f32.mrf.mxu3 }
 0x240   :  { %v345_v56 = vadd.f32 %v494_v54, %v344_v55 }
 0x242   :  { %350 = vst.msk [vmem:[%s661_s9] sm:$0xff] %vm349_vm2, %v345_v56 }
 0x247   :  { %v346_v57 = vpop.f32.mrf.mxu3 }
 0x248   :  { %v347_v58 = vadd.f32 %v494_v54, %v346_v57 }
 0x24a   :  { %351 = vst.msk [vmem:[%s661_s9 + $0x8] sm:$0xff] %vm349_vm2, %v347_v58 }
 0x24b   :  { %356 = vsyncpa [#allocation3], 1 }

</bundles_post_ra>
